<compile_context>
chip_gen: v7x
topology: tpu7x:2x2x1
jax: 0.10.0
libtpu: 0.0.40
codegen_flags: <defaults>
</compile_context>

<pallas_src>
import functools

import jax
import jax.numpy as jnp
from jax.experimental import pallas as pl
from jax.experimental.pallas import tpu as pltpu


def _prediction_head_kernel(x_ref, ln_ref, w_ref, b_ref, o_ref, y_ref):
    # x_ref:  (TB, E)  f32   CLS activations (resident across the j loop)
    # ln_ref: (2,  E)  f32   row 0 = LayerNorm gamma, row 1 = LayerNorm beta
    # w_ref:  (E,  TO) bf16  Linear weight column tile (zero-padded on O)
    # b_ref:  (1,  TO) f32   Linear bias column tile (zero-padded on O)
    # o_ref:  (TB, TO)       output tile
    # y_ref:  (TB, E)  bf16  scratch: LayerNorm+ReLU result, computed once per
    #                        batch tile and reused for every column tile.

    @pl.when(pl.program_id(1) == 0)
    def _():
        x = x_ref[...].astype(jnp.float32)
        gamma = ln_ref[0:1, :]                      # (1, E)
        beta = ln_ref[1:2, :]                       # (1, E)
        # One-pass LN stats in f32 (eps matches torch default 1e-5).
        mean = jnp.mean(x, axis=-1, keepdims=True)
        mean_sq = jnp.mean(x * x, axis=-1, keepdims=True)
        var = mean_sq - mean * mean
        scale = jax.lax.rsqrt(var + 1e-5)
        y = (x - mean) * scale * gamma + beta
        y = jnp.maximum(y, 0.0)                     # ReLU
        y_ref[...] = y.astype(y_ref.dtype)          # bf16 only at MXU boundary

    out = jnp.dot(y_ref[...], w_ref[...],
                  preferred_element_type=jnp.float32) + b_ref[...]
    o_ref[...] = out.astype(o_ref.dtype)


def prepare_params(gamma, beta, w, b):
    """One-time parameter prep (outside the per-call path): pad the output dim
    to a lane-dense multiple of 128, cast the weight to bf16, fuse gamma/beta
    into a single (2, E) slab."""
    E, O = w.shape
    O_pad = ((O + 127) // 128) * 128
    if O_pad != O:
        w = jnp.pad(w, ((0, 0), (0, O_pad - O)))
        b = jnp.pad(b, (0, O_pad - O))
    w_bf16 = jnp.asarray(w, dtype=jnp.bfloat16)                  # (E, O_pad)
    b2 = jnp.asarray(b, dtype=jnp.float32).reshape(1, O_pad)     # (1, O_pad)
    ln = jnp.stack([gamma, beta]).astype(jnp.float32)            # (2, E)
    return ln, w_bf16, b2, O


@functools.partial(jax.jit, static_argnames=("out_dim",))
def prediction_head(x, ln, w_bf16, b2, *, out_dim):
    """x: (B, S, E). Params from prepare_params. Returns (B, out_dim)."""
    B, S, E = x.shape
    E_w, O_pad = w_bf16.shape
    assert E_w == E

    # ---- CLS slice in the wrapper (XLA slice touches only B*E bytes) --------
    x_cls = x[:, 0, :]                                            # (B, E)

    # ---- batch padding / tiling ---------------------------------------------
    B_pad = ((B + 7) // 8) * 8                 # sublane-aligned
    TB = min(B_pad, 256)                       # batch tile (MXU M dim)
    B_pad = ((B_pad + TB - 1) // TB) * TB      # divisible by TB
    if B_pad != B:
        x_cls = jnp.pad(x_cls, ((0, B_pad - B), (0, 0)))

    # Output tile: lane-dense multiple of 128, 256-aligned (512 wide) when O
    # allows; tiny resident (E, TO) bf16 blocks fit easily in v7x's 64 MiB.
    TO = min(O_pad, 512)

    grid = (B_pad // TB, O_pad // TO)

    out_padded = pl.pallas_call(
        _prediction_head_kernel,
        out_shape=jax.ShapeDtypeStruct((B_pad, O_pad), x.dtype),
        grid=grid,
        in_specs=[
            # CLS slab: constant across j -> DMA'd once per batch tile.
            pl.BlockSpec((TB, E), lambda i, j: (i, 0)),
            pl.BlockSpec((2, E), lambda i, j: (0, 0)),     # gamma/beta, resident
            pl.BlockSpec((E, TO), lambda i, j: (0, j)),    # weight column tile
            pl.BlockSpec((1, TO), lambda i, j: (0, j)),    # bias column tile
        ],
        out_specs=pl.BlockSpec((TB, TO), lambda i, j: (i, j)),
        scratch_shapes=[pltpu.VMEM((TB, E), jnp.bfloat16)],  # hoisted LN+ReLU(y)
        compiler_params=pltpu.CompilerParams(
            # i: independent batch tiles (megacore-shardable);
            # j: carries the y scratch across column tiles -> arbitrary.
            dimension_semantics=("parallel", "arbitrary"),
        ),
    )(x_cls, ln, w_bf16, b2)

    return out_padded[:B, :out_dim]


if __name__ == "__main__":
    # Small shapes consistent with the module: batch=2, seq=8, embed_dim=32,
    # output_dim=16.
    B, S, E, O = 2, 8, 32, 16

    key = jax.random.PRNGKey(0)
    kx, kw, kb = jax.random.split(key, 3)

    x = jax.random.normal(kx, (B, S, E), dtype=jnp.float32)

    # Deterministic synthetic parameters (nn.LayerNorm(E), nn.Linear(E, O)).
    gamma = jnp.ones((E,), dtype=jnp.float32)
    beta = jnp.zeros((E,), dtype=jnp.float32)
    w = jax.random.normal(kw, (E, O), dtype=jnp.float32) * (1.0 / jnp.sqrt(E))
    b = jax.random.normal(kb, (O,), dtype=jnp.float32) * 0.01

    ln, w_bf16, b2, out_dim = prepare_params(gamma, beta, w, b)
    out = prediction_head(x, ln, w_bf16, b2, out_dim=out_dim)
    jax.block_until_ready(out)

    # Pure-JAX f32 reference (kernel uses bf16 MXU operands -> loose tolerance).
    cls = x[:, 0]
    mean = jnp.mean(cls, axis=-1, keepdims=True)
    var = jnp.mean((cls - mean) ** 2, axis=-1, keepdims=True)
    ref = jnp.maximum((cls - mean) * jax.lax.rsqrt(var + 1e-5) * gamma + beta,
                      0.0) @ w + b

    assert out.shape == (B, O)
    assert jnp.allclose(out, ref, atol=5e-2, rtol=5e-2), float(
        jnp.max(jnp.abs(out - ref)))

    print("KERNEL_OK")
</pallas_src>

<mosaic_0001>
module attributes {stable_mosaic.version = 11 : i64} {
  func.func @_prediction_head_kernel(%arg0: i32, %arg1: i32, %arg2: memref<8x32xf32, #tpu.memory_space<vmem>>, %arg3: memref<2x32xf32, #tpu.memory_space<vmem>>, %arg4: memref<32x128xbf16, #tpu.memory_space<vmem>>, %arg5: memref<1x128xf32, #tpu.memory_space<vmem>>, %arg6: memref<8x128xf32, #tpu.memory_space<vmem>>, %arg7: memref<8x32xbf16, #tpu.memory_space<vmem>>) attributes {dimension_semantics = [#tpu.dimension_semantics<parallel>, #tpu.dimension_semantics<arbitrary>], iteration_bounds = array<i64: 1, 1>, scalar_prefetch = 0 : i64, scratch_operands = 1 : i64, tpu.core_type = #tpu.core_type<tc>, window_params = [{transform_indices = @transform_0, window_bounds = array<i64: 8, 32>}, {pipeline_mode = #tpu.pipeline_mode<synchronous>, transform_indices = @transform_1, window_bounds = array<i64: 2, 32>}, {transform_indices = @transform_2, window_bounds = array<i64: 32, 128>}, {transform_indices = @transform_3, window_bounds = array<i64: 1, 128>}, {transform_indices = @transform_4, window_bounds = array<i64: 8, 128>}]} {
    %c0_i32 = arith.constant 0 : i32
    %0 = arith.cmpi eq, %arg1, %c0_i32 : i32
    %1 = arith.extui %0 : i1 to i32
    %c0_i32_0 = arith.constant 0 : i32
    %2 = arith.cmpi ne, %1, %c0_i32_0 : i32
    scf.if %2 {
      %c0_8 = arith.constant 0 : index
      %c0_9 = arith.constant 0 : index
      %10 = vector.load %arg2[%c0_8, %c0_9] : memref<8x32xf32, #tpu.memory_space<vmem>>, vector<8x32xf32>
      %c0_10 = arith.constant 0 : index
      %c0_11 = arith.constant 0 : index
      %11 = vector.load %arg3[%c0_10, %c0_11] : memref<2x32xf32, #tpu.memory_space<vmem>>, vector<1x32xf32>
      %c1 = arith.constant 1 : index
      %c0_12 = arith.constant 0 : index
      %12 = vector.load %arg3[%c1, %c0_12] : memref<2x32xf32, #tpu.memory_space<vmem>>, vector<1x32xf32>
      %cst_13 = arith.constant dense<0.000000e+00> : vector<8xf32>
      %13 = vector.multi_reduction <add>, %10, %cst_13 [1] : vector<8x32xf32> to vector<8xf32>
      %14 = vector.shape_cast %13 : vector<8xf32> to vector<8x1xf32>
      %cst_14 = arith.constant 3.200000e+01 : f32
      %15 = vector.broadcast %cst_14 : f32 to vector<8x1xf32>
      %16 = arith.divf %14, %15 : vector<8x1xf32>
      %17 = arith.mulf %10, %10 : vector<8x32xf32>
      %cst_15 = arith.constant dense<0.000000e+00> : vector<8xf32>
      %18 = vector.multi_reduction <add>, %17, %cst_15 [1] : vector<8x32xf32> to vector<8xf32>
      %19 = vector.shape_cast %18 : vector<8xf32> to vector<8x1xf32>
      %cst_16 = arith.constant 3.200000e+01 : f32
      %20 = vector.broadcast %cst_16 : f32 to vector<8x1xf32>
      %21 = arith.divf %19, %20 : vector<8x1xf32>
      %22 = arith.mulf %16, %16 : vector<8x1xf32>
      %23 = arith.subf %21, %22 : vector<8x1xf32>
      %cst_17 = arith.constant 9.99999974E-6 : f32
      %24 = vector.broadcast %cst_17 : f32 to vector<8x1xf32>
      %25 = arith.addf %23, %24 : vector<8x1xf32>
      %26 = math.rsqrt %25 : vector<8x1xf32>
      %27 = vector.broadcast %16 : vector<8x1xf32> to vector<8x32xf32>
      %28 = arith.subf %10, %27 : vector<8x32xf32>
      %29 = vector.broadcast %26 : vector<8x1xf32> to vector<8x32xf32>
      %30 = arith.mulf %28, %29 : vector<8x32xf32>
      %31 = vector.broadcast %11 : vector<1x32xf32> to vector<8x32xf32>
      %32 = arith.mulf %30, %31 : vector<8x32xf32>
      %33 = vector.broadcast %12 : vector<1x32xf32> to vector<8x32xf32>
      %34 = arith.addf %32, %33 : vector<8x32xf32>
      %cst_18 = arith.constant 0.000000e+00 : f32
      %35 = vector.broadcast %cst_18 : f32 to vector<8x32xf32>
      %36 = arith.maximumf %34, %35 : vector<8x32xf32>
      %37 = arith.truncf %36 : vector<8x32xf32> to vector<8x32xbf16>
      %c0_19 = arith.constant 0 : index
      %c0_20 = arith.constant 0 : index
      %38 = vector.load %arg7[%c0_19, %c0_20] : memref<8x32xbf16, #tpu.memory_space<vmem>>, vector<8x32xbf16>
      tpu.vector_store %arg7[%c0_19, %c0_20], %37 {strides = array<i32>} : memref<8x32xbf16, #tpu.memory_space<vmem>>, vector<8x32xbf16>,
    } else {
    }
    %c0 = arith.constant 0 : index
    %c0_1 = arith.constant 0 : index
    %3 = vector.load %arg7[%c0, %c0_1] : memref<8x32xbf16, #tpu.memory_space<vmem>>, vector<8x32xbf16>
    %c0_2 = arith.constant 0 : index
    %c0_3 = arith.constant 0 : index
    %4 = vector.load %arg4[%c0_2, %c0_3] : memref<32x128xbf16, #tpu.memory_space<vmem>>, vector<32x128xbf16>
    %cst = arith.constant dense<0.000000e+00> : vector<8x128xf32>
    %5 = tpu.matmul %3, %4, %cst {dimension_numbers = #tpu.dot_dimension_numbers<[1], [0], [0], [1], [0, 0, 1, 1], [], []>} : vector<8x32xbf16>, vector<32x128xbf16>, vector<8x128xf32> -> vector<8x128xf32>
    %c0_4 = arith.constant 0 : index
    %c0_5 = arith.constant 0 : index
    %6 = vector.load %arg5[%c0_4, %c0_5] : memref<1x128xf32, #tpu.memory_space<vmem>>, vector<1x128xf32>
    %7 = vector.broadcast %6 : vector<1x128xf32> to vector<8x128xf32>
    %8 = arith.addf %5, %7 : vector<8x128xf32>
    %c0_6 = arith.constant 0 : index
    %c0_7 = arith.constant 0 : index
    %9 = vector.load %arg6[%c0_6, %c0_7] : memref<8x128xf32, #tpu.memory_space<vmem>>, vector<8x128xf32>
    tpu.vector_store %arg6[%c0_6, %c0_7], %8 {strides = array<i32>} : memref<8x128xf32, #tpu.memory_space<vmem>>, vector<8x128xf32>,
    return
  }
  func.func @transform_0(%arg0: i32, %arg1: i32) -> (i32, i32) {
    %c0_i32 = arith.constant 0 : i32
    %c0_i32_0 = arith.constant 0 : i32
    return %arg0, %c0_i32 : i32, i32
  }
  func.func @transform_1(%arg0: i32, %arg1: i32) -> (i32, i32) {
    %c0_i32 = arith.constant 0 : i32
    %c0_i32_0 = arith.constant 0 : i32
    %c0_i32_1 = arith.constant 0 : i32
    return %c0_i32, %c0_i32_0 : i32, i32
  }
  func.func @transform_2(%arg0: i32, %arg1: i32) -> (i32, i32) {
    %c0_i32 = arith.constant 0 : i32
    %c0_i32_0 = arith.constant 0 : i32
    return %c0_i32, %arg1 : i32, i32
  }
  func.func @transform_3(%arg0: i32, %arg1: i32) -> (i32, i32) {
    %c0_i32 = arith.constant 0 : i32
    %c0_i32_0 = arith.constant 0 : i32
    return %c0_i32, %arg1 : i32, i32
  }
  func.func @transform_4(%arg0: i32, %arg1: i32) -> (i32, i32) {
    %c0_i32 = arith.constant 0 : i32
    return %arg0, %arg1 : i32, i32
  }
}

</mosaic_0001>

<bundles_post_ra>
// kernel: prediction_head.1
= control target key start
LH: loop header
LB: loop body
LE: loop exit
PB: predicated region body
PF: predicated region fallthrough
CT: control target
= control target key end

     0   :  { %vm25_vm0 = vcmask 261120   ;;  %v152_v5 = vmov 0.0   ;;  %vm153_vm1 = vmmov 0   ;;  %vm54_vm2 = vcmask 257024   ;;  %s203_s0 = inlined_call_operand.vmem [shape: f32[8,32], index: 0, kind: input, shape index: {}]   ;;  %s204_s2 = inlined_call_operand.vmem [shape: bf16[32,128], index: 2, kind: input, shape index: {}]   ;;  %s205_s1 = inlined_call_operand.vmem [shape: f32[2,32], index: 1, kind: input, shape index: {}]   ;;  %s206_s3 = inlined_call_operand.vmem [shape: f32[1,128], index: 3, kind: input, shape index: {}]   ;;  %s207_s4 = inlined_call_operand.vmem [shape: f32[8,128], index: 4, kind: output, shape index: {}]  }
   0x1   :  { %v22_v0 = vld [vmem:[%s203_s0] sm:$0xff]  ;;  %138 = vmatprep.subr.bf16.mxu0 %v152_v5  ;;  %v149_v6 = vld [vmem:[%s204_s2 + $0x8] sm:$0xff]   ;;  %142 = vmatprep.mubr.msk.bf16.mxu0 %vm153_vm1, %v152_v5 }
   0x2   :  { %v26_v1 = vsel %vm25_vm0, %v22_v0, 0.0  ;;  %v31_v2 = vmul.f32 %v22_v0, %v22_v0  ;;  %v148_v4 = vld [vmem:[%s204_s2] sm:$0xff]  }
   0x3   :  { %27 = vadd.xlane.f32.xlu0 %v26_v1  ;;  %139 = vmatpush3.bf16.msra.mxu0 %v148_v4  ;;  %v129_v16 = vld [vmem:[%s205_s1] ss:$0 sm:$0xff]  ;;  %v130_v18 = vld [vmem:[%s205_s1 + $0x1] ss:$0 sm:$0xff] }
   0x4   :  { %v32_v3 = vsel %vm25_vm0, %v31_v2, 0.0  ;;  %140 = vmatprep.subr.bf16.mxu0 %v152_v5  ;;  %v131_v24 = vld [vmem:[%s206_s3] ss:$0 sm:$0xff] }
   0x7   :  { %33 = vadd.xlane.f32.xlu0 %v32_v3  ;;  %141 = vmatpush3.bf16.msra.mxu0 %v149_v6 }
  0x90   :  { %v28_v7 = vpop.xlane.xlu0 %27 }
  0x91   :  { %v30_v8 = vmul.f32 0.03125, %v28_v7 }
  0x93   :  { %v36_v10 = vmul.f32 %v30_v8, %v30_v8  ;;  %v40_v14 = vsub.f32 %v22_v0, %v30_v8 }
  0x94   :  { %v34_v9 = vpop.xlane.xlu0 %33 }
  0x95   :  { %v35_v11 = vmul.f32 0.03125, %v34_v9 }
  0x97   :  { %v37_v12 = vsub.f32 %v35_v11, %v36_v10 }
  0x99   :  { %v38_v13 = vadd.f32 1e-05, %v37_v12 }
  0x9b   :  { %150 = vrsqrt.f32 %v38_v13 }
  0xa5   :  { %v151_v15 = vpop.eup %150 }
  0xa6   :  { %v41_v17 = vmul.f32 %v151_v15, %v40_v14 }
  0xa8   :  { %v46_v19 = vmul.f32 %v129_v16, %v41_v17 }
  0xaa   :  { %v51_v20 = vadd.f32 %v130_v18, %v46_v19 }
  0xac   :  { %v52_v21 = vmax.f32 %v51_v20, 0.0 }
  0xae   :  { %v53_v22 = vpack.c.bf16 %v52_v21, %v52_v21 }
  0xb0   :  { %55 = vst.msk [vmem:[#allocation2] sm:$0xf] %vm54_vm2, %v53_v22 }
  0xb7   :  { %v56_v23 = vld [vmem:[#allocation2] sm:$0xf] }
  0xb8   :  { %143 = vmatmul.mubr.msk.bf16.vlgmr.msra.gmra.mrb[0].mxu0 %vm25_vm0, %v56_v23 }
 0x18b   :  { %v118_v25 = vpop.f32.mrb[0].mxu0 }
 0x18c   :  { %v119_v26 = vadd.f32 %v131_v24, %v118_v25  ;;  %v144_v27 = vpop.f32.mrb[1].mxu0 }
 0x18d   :  { %v121_v28 = vpop.f32.mrb[2].mxu0 }
 0x18e   :  { %124 = vst [vmem:[%s207_s4] sm:$0xff] %v119_v26  ;;  %v145_v29 = vpop.f32.mrb[3].mxu0 }

</bundles_post_ra>
